<compile_context>
chip_gen: v7x
topology: tpu7x:2x2x1
jax: 0.10.0
libtpu: 0.0.40
codegen_flags: <defaults>
</compile_context>

<pallas_src>
import functools

import jax
import jax.numpy as jnp
from jax.experimental import pallas as pl
from jax.experimental.pallas import tpu as pltpu


LANE = 128


def _round_up(x, m):
    return ((x + m - 1) // m) * m


# --------------------------------------------------------------------------------------
# Pass 1: fused dual-conv GEMM + bias + leaky-relu + sigmoid gate, plus per-tile partial
# instance-norm statistics (sum, sum-of-squares) per channel.
# One program = (batch n, spatial row-tile t).
# --------------------------------------------------------------------------------------
def _gated_conv_pass1(
    p_ref,      # (1, hw_tile, Kpad)  bf16  im2col patches
    w_ref,      # (Kpad, 2*Cp)        bf16  fused [feature | mask] weights
    b_ref,      # (1, 2*Cp)           f32   fused biases
    y_ref,      # (1, hw_tile, Cp)    f32   gated (un-normalized) output tile
    stats_ref,  # (1, 1, 2, Cp)       f32   per-tile [sum; sum_sq] over rows
    *,
    cp,
    hw_valid,
    hw_tile,
    needs_mask,
):
    # One MXU GEMM covers both convolutions over the full contraction K = k*k*C_in.
    acc = jnp.dot(p_ref[0], w_ref[...], preferred_element_type=jnp.float32)  # (hw_tile, 2Cp)
    acc = acc + b_ref[...]

    feats = acc[:, :cp]           # lane-aligned split (Cp is a multiple of 128)
    m = acc[:, cp:]

    feats = jnp.where(feats >= 0, feats, jnp.float32(0.2) * feats)    # leaky_relu(0.2)
    gate = 1.0 / (1.0 + jnp.exp(-m))                                  # sigmoid (exp on EUP)
    out = gate * feats                                                # (hw_tile, Cp)

    if needs_mask:
        # Zero rows past the true spatial extent so they do not pollute the IN statistics.
        t = pl.program_id(1)
        row = jax.lax.broadcasted_iota(jnp.int32, (hw_tile, 1), 0) + t * hw_tile
        out = jnp.where(row < hw_valid, out, jnp.float32(0.0))

    y_ref[0] = out

    ssum = jnp.sum(out, axis=0, keepdims=True)           # (1, Cp)
    ssq = jnp.sum(out * out, axis=0, keepdims=True)      # (1, Cp)
    stats_ref[0, 0] = jnp.concatenate([ssum, ssq], axis=0)


# --------------------------------------------------------------------------------------
# Pass 2: apply the per-image, per-channel instance-norm affine (x - mean) * rstd.
# --------------------------------------------------------------------------------------
def _instance_norm_pass2(y_ref, mu_ref, rs_ref, o_ref):
    o_ref[0] = (y_ref[0] - mu_ref[0]) * rs_ref[0]


def _pick_hw_tile(hw, kpad, cp, *, budget_bytes=20 * 1024 * 1024, max_rows=1024):
    """Largest multiple-of-8 row tile whose per-tile VMEM footprint fits the budget."""
    fixed = 2 * (kpad * 2 * cp * 2) + 2 * (2 * cp * 4) + 2 * (8 * cp * 4)   # weights/bias/stats
    per_row = 2 * (kpad * 2) + 2 * (cp * 4) + 2 * (2 * cp * 4) + 2 * (cp * 4)
    avail = max(budget_bytes - fixed, 8 * per_row)
    rows = max(8, min(max_rows, (avail // per_row) // 8 * 8))
    return int(rows)


# --------------------------------------------------------------------------------------
# Host-side spectral norm (tiny power iteration, mirrors torch.nn.utils.spectral_norm on
# weight.view(out, -1)); computed once and folded into the weights.
# --------------------------------------------------------------------------------------
def _spectral_sigma(w_oihw, key, n_power_iterations=1, eps=1e-12):
    out_ch = w_oihw.shape[0]
    w2d = w_oihw.reshape(out_ch, -1)
    u = jax.random.normal(key, (out_ch,), dtype=jnp.float32)
    u = u / jnp.maximum(jnp.linalg.norm(u), eps)
    v = None
    for _ in range(max(1, n_power_iterations)):
        v = w2d.T @ u
        v = v / jnp.maximum(jnp.linalg.norm(v), eps)
        u = w2d @ v
        u = u / jnp.maximum(jnp.linalg.norm(u), eps)
    return u @ (w2d @ v)


class GatedConv2dWithSpectral:
    """JAX/Pallas port of model/EqualizedModules.py::GatedConv2dWithSpectral."""

    def __init__(self, in_channels, out_channels, kernel_size, stride, padding=0,
                 bias=True, normalization=True, *, gain=2 ** 0.5, use_wscale=False,
                 lrmul=1.0, n_power_iterations=1, key=None):
        self.in_channels = in_channels
        self.out_channels = out_channels
        self.kernel_size = kernel_size
        self.stride = stride
        self.padding = padding
        self.normalization = normalization

        k = kernel_size
        he_std = gain * (in_channels * k ** 2) ** (-0.5)
        if use_wscale:
            init_std = 1.0 / lrmul
            w_lrmul = he_std * lrmul
        else:
            init_std = he_std / lrmul
            w_lrmul = lrmul
        self.b_lrmul = lrmul

        if key is None:
            key = jax.random.PRNGKey(0)
        kf, km, kuf, kum = jax.random.split(key, 4)

        w_feat = jax.random.normal(kf, (out_channels, in_channels, k, k), jnp.float32) * init_std
        w_mask = jax.random.normal(km, (out_channels, in_channels, k, k), jnp.float32) * init_std

        # Fold spectral normalization and equalized-LR scaling into the parameters once.
        sigma_f = _spectral_sigma(w_feat, kuf, n_power_iterations)
        sigma_m = _spectral_sigma(w_mask, kum, n_power_iterations)
        self.w_feat_oihw = w_feat * (w_lrmul / sigma_f)
        self.w_mask_oihw = w_mask * (w_lrmul / sigma_m)
        self.b_feat = jnp.zeros((out_channels,), jnp.float32)   # PyTorch init: zeros
        self.b_mask = jnp.zeros((out_channels,), jnp.float32)
        self.has_bias = bias

        self._pack_params()

    def load_biases(self, b_feat, b_mask):
        """Replace raw bias parameters (b_lrmul applied like the PyTorch forward)."""
        self.b_feat = jnp.asarray(b_feat, jnp.float32) * self.b_lrmul
        self.b_mask = jnp.asarray(b_mask, jnp.float32) * self.b_lrmul
        self._pack_params()

    def _pack_params(self):
        k, I, O = self.kernel_size, self.in_channels, self.out_channels
        K = k * k * I
        self.k_dim = K
        self.k_pad = _round_up(K, 8)
        self.c_out_pad = _round_up(O, LANE)
        pad_k, pad_c = self.k_pad - K, self.c_out_pad - O

        def to_ko(w_oihw):  # (O,I,k,k) -> (K, O), K ordered as (ky, kx, c_in)
            return jnp.transpose(w_oihw, (2, 3, 1, 0)).reshape(K, O)

        wf = jnp.pad(to_ko(self.w_feat_oihw), ((0, pad_k), (0, pad_c)))
        wm = jnp.pad(to_ko(self.w_mask_oihw), ((0, pad_k), (0, pad_c)))
        # Fused [feature | mask] weight stream -> one MXU matmul per tile.
        self.w_fused = jnp.concatenate([wf, wm], axis=1).astype(jnp.bfloat16)   # (Kpad, 2*Cp)
        bf = jnp.pad(self.b_feat, (0, pad_c))
        bm = jnp.pad(self.b_mask, (0, pad_c))
        self.b_fused = jnp.concatenate([bf, bm]).reshape(1, -1).astype(jnp.float32)

    def __call__(self, x, *, hw_tile=None):
        # x: (N, C_in, H, W) float32, NCHW as in the PyTorch module.
        N, C, H, W = x.shape
        assert C == self.in_channels
        k, s, p = self.kernel_size, self.stride, self.padding
        H_out = (H + 2 * p - k) // s + 1
        W_out = (W + 2 * p - k) // s + 1
        HW = H_out * W_out
        Cp, Kp, K = self.c_out_pad, self.k_pad, self.k_dim

        # Layout plumbing on the host: NCHW -> NHWC, spatial zero-pad, im2col.
        x_nhwc = jnp.transpose(x, (0, 2, 3, 1)).astype(jnp.float32)
        x_p = jnp.pad(x_nhwc, ((0, 0), (p, p), (p, p), (0, 0)))
        taps = []
        for ky in range(k):
            for kx in range(k):
                taps.append(x_p[:, ky:ky + s * (H_out - 1) + 1:s,
                                kx:kx + s * (W_out - 1) + 1:s, :])
        patches = jnp.concatenate(taps, axis=-1).reshape(N, HW, K)
        # TODO(synk): for large C_in, build the im2col tile inside the kernel from a row
        # block of x (host im2col multiplies input HBM bytes by k*k; fine for tiny C_in).

        if hw_tile is None:
            hw_tile = _pick_hw_tile(HW, Kp, Cp)
        hw_tile = int(min(_round_up(int(hw_tile), 8), _round_up(HW, 8)))
        HW_pad = _round_up(HW, hw_tile)
        T = HW_pad // hw_tile

        patches = jnp.pad(patches, ((0, 0), (0, HW_pad - HW), (0, Kp - K))).astype(jnp.bfloat16)

        # Explicit VMEM budget for the chosen tile (double-buffered blocks + temps).
        est = (2 * hw_tile * Kp * 2          # patch blocks (bf16, double-buffered)
               + 2 * Kp * 2 * Cp * 2         # fused weights (bf16, double-buffered)
               + 2 * 2 * Cp * 4              # bias
               + 2 * hw_tile * Cp * 4        # y output blocks (f32, double-buffered)
               + 2 * 8 * Cp * 4              # stats output blocks
               + 2 * hw_tile * 2 * Cp * 4)   # GEMM result + elementwise temps
        vmem_limit = int(min(max(2 * est, 32 * 1024 * 1024), 64 * 1024 * 1024))

        kernel1 = functools.partial(
            _gated_conv_pass1, cp=Cp, hw_valid=HW, hw_tile=hw_tile,
            needs_mask=(HW_pad != HW))

        flops = 2 * N * HW_pad * Kp * (2 * Cp)
        transcendentals = N * HW_pad * Cp
        bytes1 = int(N * HW_pad * Kp * 2 + Kp * 2 * Cp * 2 + 2 * Cp * 4
                     + N * HW_pad * Cp * 4 + N * T * 2 * Cp * 4)

        y, stats = pl.pallas_call(
            kernel1,
            out_shape=(jax.ShapeDtypeStruct((N, HW_pad, Cp), jnp.float32),
                       jax.ShapeDtypeStruct((N, T, 2, Cp), jnp.float32)),
            grid_spec=pltpu.PrefetchScalarGridSpec(
                num_scalar_prefetch=0,
                grid=(N, T),
                in_specs=[
                    pl.BlockSpec((1, hw_tile, Kp), lambda n, t: (n, t, 0)),
                    pl.BlockSpec((Kp, 2 * Cp), lambda n, t: (0, 0)),
                    pl.BlockSpec((1, 2 * Cp), lambda n, t: (0, 0)),
                ],
                out_specs=[
                    pl.BlockSpec((1, hw_tile, Cp), lambda n, t: (n, t, 0)),
                    pl.BlockSpec((1, 1, 2, Cp), lambda n, t: (n, t, 0, 0)),
                ],
            ),
            compiler_params=pltpu.CompilerParams(
                dimension_semantics=("parallel", "parallel"),
                vmem_limit_bytes=vmem_limit),
            cost_estimate=pl.CostEstimate(
                flops=int(flops), transcendentals=int(transcendentals),
                bytes_accessed=bytes1),
        )(patches, self.w_fused, self.b_fused)

        if self.normalization:
            # Tiny host reduction of per-tile partial stats -> per-image channel stats.
            s_tot = jnp.sum(stats, axis=1)                       # (N, 2, Cp)
            mean = s_tot[:, 0, :] / HW                           # (N, Cp)
            var = jnp.maximum(s_tot[:, 1, :] / HW - mean * mean, 0.0)
            rstd = jax.lax.rsqrt(var + 1e-5)
            mean3 = mean.reshape(N, 1, Cp)
            rstd3 = rstd.reshape(N, 1, Cp)

            y = pl.pallas_call(
                _instance_norm_pass2,
                out_shape=jax.ShapeDtypeStruct((N, HW_pad, Cp), jnp.float32),
                grid_spec=pltpu.PrefetchScalarGridSpec(
                    num_scalar_prefetch=0,
                    grid=(N, T),
                    in_specs=[
                        pl.BlockSpec((1, hw_tile, Cp), lambda n, t: (n, t, 0)),
                        pl.BlockSpec((1, 1, Cp), lambda n, t: (n, 0, 0)),
                        pl.BlockSpec((1, 1, Cp), lambda n, t: (n, 0, 0)),
                    ],
                    out_specs=pl.BlockSpec((1, hw_tile, Cp), lambda n, t: (n, t, 0)),
                ),
                compiler_params=pltpu.CompilerParams(
                    dimension_semantics=("parallel", "parallel"),
                    vmem_limit_bytes=vmem_limit),
                cost_estimate=pl.CostEstimate(
                    flops=int(2 * N * HW_pad * Cp), transcendentals=0,
                    bytes_accessed=int(2 * N * HW_pad * Cp * 4 + 2 * N * Cp * 4)),
            )(y, mean3, rstd3)

        out = y[:, :HW, :self.out_channels].reshape(N, H_out, W_out, self.out_channels)
        return jnp.transpose(out, (0, 3, 1, 2))  # back to NCHW


# --------------------------------------------------------------------------------------
# Pure-JAX reference of the same forward, with the same bf16 operand rounding the kernel
# uses (so the comparison validates kernel logic, not quantization).
# --------------------------------------------------------------------------------------
def _reference_forward(layer, x):
    def r(v):
        return v.astype(jnp.bfloat16).astype(jnp.float32)

    wf, wm = r(layer.w_feat_oihw), r(layer.w_mask_oihw)
    xr = r(x.astype(jnp.float32))
    dn = jax.lax.conv_dimension_numbers(xr.shape, wf.shape, ("NCHW", "OIHW", "NCHW"))
    pad = [(layer.padding, layer.padding)] * 2
    strides = (layer.stride, layer.stride)

    feats = jax.lax.conv_general_dilated(
        xr, wf, strides, pad, dimension_numbers=dn,
        precision=jax.lax.Precision.HIGHEST) + layer.b_feat.reshape(1, -1, 1, 1)
    feats = jnp.where(feats >= 0, feats, 0.2 * feats)

    mask = jax.lax.conv_general_dilated(
        xr, wm, strides, pad, dimension_numbers=dn,
        precision=jax.lax.Precision.HIGHEST) + layer.b_mask.reshape(1, -1, 1, 1)
    mask = 1.0 / (1.0 + jnp.exp(-mask))

    out = mask * feats
    if layer.normalization:
        mean = out.mean(axis=(2, 3), keepdims=True)
        var = ((out - mean) ** 2).mean(axis=(2, 3), keepdims=True)
        out = (out - mean) * jax.lax.rsqrt(var + 1e-5)
    return out


if __name__ == "__main__":
    key = jax.random.PRNGKey(0)
    k_x1, k_x2, k_x3, k_l1, k_l2, k_l3, k_b1, k_b2 = jax.random.split(key, 8)

    # 1) Base case: 16x16, stride 1, instance norm, single spatial tile per image.
    x1 = jax.random.normal(k_x1, (2, 4, 16, 16), jnp.float32)
    layer1 = GatedConv2dWithSpectral(4, 8, 3, 1, padding=1, bias=True,
                                     normalization=True, key=k_l1)
    out1 = jax.block_until_ready(layer1(x1))
    assert out1.shape == (2, 8, 16, 16), out1.shape
    ref1 = _reference_forward(layer1, x1)
    err1 = float(jnp.max(jnp.abs(out1 - ref1)))
    assert err1 < 2e-3, f"case1 max abs error vs reference: {err1}"

    # 2) Odd spatial extent + forced small row tile: exercises multi-tile grid,
    #    cross-tile instance-norm stats and padded-row masking; nonzero biases.
    x2 = jax.random.normal(k_x2, (2, 4, 10, 10), jnp.float32)
    layer2 = GatedConv2dWithSpectral(4, 8, 3, 1, padding=1, bias=True,
                                     normalization=True, key=k_l2)
    layer2.load_biases(0.3 * jax.random.normal(k_b1, (8,), jnp.float32),
                       0.3 * jax.random.normal(k_b2, (8,), jnp.float32))
    out2 = jax.block_until_ready(layer2(x2, hw_tile=64))
    assert out2.shape == (2, 8, 10, 10), out2.shape
    ref2 = _reference_forward(layer2, x2)
    err2 = float(jnp.max(jnp.abs(out2 - ref2)))
    assert err2 < 2e-3, f"case2 max abs error vs reference: {err2}"

    # 3) Stride 2, no normalization (stride handled by host-side im2col slicing).
    x3 = jax.random.normal(k_x3, (2, 4, 16, 16), jnp.float32)
    layer3 = GatedConv2dWithSpectral(4, 8, 3, 2, padding=1, bias=True,
                                     normalization=False, key=k_l3)
    out3 = jax.block_until_ready(layer3(x3))
    assert out3.shape == (2, 8, 8, 8), out3.shape
    ref3 = _reference_forward(layer3, x3)
    err3 = float(jnp.max(jnp.abs(out3 - ref3)))
    assert err3 < 2e-3, f"case3 max abs error vs reference: {err3}"

    print("KERNEL_OK")
</pallas_src>

<mosaic_0001>
module attributes {stable_mosaic.version = 11 : i64} {
  func.func @_gated_conv_pass1(%arg0: i32, %arg1: i32, %arg2: memref<1x256x40xbf16, #tpu.memory_space<vmem>>, %arg3: memref<40x256xbf16, #tpu.memory_space<vmem>>, %arg4: memref<1x256xf32, #tpu.memory_space<vmem>>, %arg5: memref<1x256x128xf32, #tpu.memory_space<vmem>>, %arg6: memref<1x1x2x128xf32, #tpu.memory_space<vmem>>) attributes {dimension_semantics = [#tpu.dimension_semantics<parallel>, #tpu.dimension_semantics<parallel>], iteration_bounds = array<i64: 2, 1>, scalar_prefetch = 0 : i64, scratch_operands = 0 : i64, tpu.core_type = #tpu.core_type<tc>, window_params = [{transform_indices = @transform_0, window_bounds = array<i64: 1, 256, 40>}, {pipeline_mode = #tpu.pipeline_mode<synchronous>, transform_indices = @transform_1, window_bounds = array<i64: 40, 256>}, {pipeline_mode = #tpu.pipeline_mode<synchronous>, transform_indices = @transform_2, window_bounds = array<i64: 1, 256>}, {transform_indices = @transform_3, window_bounds = array<i64: 1, 256, 128>}, {transform_indices = @transform_4, window_bounds = array<i64: 1, 1, 2, 128>}]} {
    %c0 = arith.constant 0 : index
    %c0_0 = arith.constant 0 : index
    %c0_1 = arith.constant 0 : index
    %0 = vector.load %arg2[%c0, %c0_0, %c0_1] : memref<1x256x40xbf16, #tpu.memory_space<vmem>>, vector<1x256x40xbf16>
    %1 = vector.shape_cast %0 : vector<1x256x40xbf16> to vector<256x40xbf16>
    %c0_2 = arith.constant 0 : index
    %c0_3 = arith.constant 0 : index
    %2 = vector.load %arg3[%c0_2, %c0_3] : memref<40x256xbf16, #tpu.memory_space<vmem>>, vector<40x256xbf16>
    %cst = arith.constant dense<0.000000e+00> : vector<256x256xf32>
    %3 = tpu.matmul %1, %2, %cst {dimension_numbers = #tpu.dot_dimension_numbers<[1], [0], [0], [1], [0, 0, 1, 1], [], []>} : vector<256x40xbf16>, vector<40x256xbf16>, vector<256x256xf32> -> vector<256x256xf32>
    %c0_4 = arith.constant 0 : index
    %c0_5 = arith.constant 0 : index
    %4 = vector.load %arg4[%c0_4, %c0_5] : memref<1x256xf32, #tpu.memory_space<vmem>>, vector<1x256xf32>
    %5 = vector.broadcast %4 : vector<1x256xf32> to vector<256x256xf32>
    %6 = arith.addf %3, %5 : vector<256x256xf32>
    %7 = vector.extract_strided_slice %6 {offsets = [0, 0], sizes = [256, 128], strides = [1, 1]} : vector<256x256xf32> to vector<256x128xf32>
    %8 = vector.extract_strided_slice %6 {offsets = [0, 128], sizes = [256, 128], strides = [1, 1]} : vector<256x256xf32> to vector<256x128xf32>
    %cst_6 = arith.constant 0.000000e+00 : f32
    %9 = vector.broadcast %cst_6 : f32 to vector<256x128xf32>
    %10 = arith.cmpf oge, %7, %9 : vector<256x128xf32>
    %cst_7 = arith.constant 2.000000e-01 : f32
    %11 = vector.broadcast %cst_7 : f32 to vector<256x128xf32>
    %12 = arith.mulf %11, %7 : vector<256x128xf32>
    %13 = arith.select %10, %7, %12 : vector<256x128xi1>, vector<256x128xf32>
    %cst_8 = arith.constant 0.000000e+00 : f32
    %14 = vector.broadcast %cst_8 : f32 to vector<256x128xf32>
    %15 = arith.subf %14, %8 : vector<256x128xf32>
    %16 = math.exp %15 : vector<256x128xf32>
    %cst_9 = arith.constant 1.000000e+00 : f32
    %17 = vector.broadcast %cst_9 : f32 to vector<256x128xf32>
    %18 = arith.addf %17, %16 : vector<256x128xf32>
    %cst_10 = arith.constant 1.000000e+00 : f32
    %19 = vector.broadcast %cst_10 : f32 to vector<256x128xf32>
    %20 = arith.divf %19, %18 : vector<256x128xf32>
    %21 = arith.mulf %20, %13 : vector<256x128xf32>
    %c0_11 = arith.constant 0 : index
    %c0_12 = arith.constant 0 : index
    %c0_13 = arith.constant 0 : index
    %22 = vector.load %arg5[%c0_11, %c0_12, %c0_13] : memref<1x256x128xf32, #tpu.memory_space<vmem>>, vector<1x256x128xf32>
    %23 = vector.shape_cast %22 : vector<1x256x128xf32> to vector<256x128xf32>
    %24 = vector.shape_cast %21 : vector<256x128xf32> to vector<1x256x128xf32>
    tpu.vector_store %arg5[%c0_11, %c0_12, %c0_13], %24 {strides = array<i32>} : memref<1x256x128xf32, #tpu.memory_space<vmem>>, vector<1x256x128xf32>,
    %cst_14 = arith.constant dense<0.000000e+00> : vector<128xf32>
    %25 = vector.multi_reduction <add>, %21, %cst_14 [0] : vector<256x128xf32> to vector<128xf32>
    %26 = vector.shape_cast %25 : vector<128xf32> to vector<1x128xf32>
    %27 = arith.mulf %21, %21 : vector<256x128xf32>
    %cst_15 = arith.constant dense<0.000000e+00> : vector<128xf32>
    %28 = vector.multi_reduction <add>, %27, %cst_15 [0] : vector<256x128xf32> to vector<128xf32>
    %29 = vector.shape_cast %28 : vector<128xf32> to vector<1x128xf32>
    %30 = tpu.concatenate %26, %29 in 0 : vector<1x128xf32>, vector<1x128xf32> -> vector<2x128xf32>
    %c0_16 = arith.constant 0 : index
    %c0_17 = arith.constant 0 : index
    %c0_18 = arith.constant 0 : index
    %c0_19 = arith.constant 0 : index
    %31 = vector.load %arg6[%c0_16, %c0_17, %c0_18, %c0_19] : memref<1x1x2x128xf32, #tpu.memory_space<vmem>>, vector<1x1x2x128xf32>
    %32 = vector.shape_cast %31 : vector<1x1x2x128xf32> to vector<2x128xf32>
    %33 = vector.shape_cast %30 : vector<2x128xf32> to vector<1x1x2x128xf32>
    tpu.vector_store %arg6[%c0_16, %c0_17, %c0_18, %c0_19], %33 {strides = array<i32>} : memref<1x1x2x128xf32, #tpu.memory_space<vmem>>, vector<1x1x2x128xf32>,
    return
  }
  func.func @transform_0(%arg0: i32, %arg1: i32) -> (i32, i32, i32) {
    %c0_i32 = arith.constant 0 : i32
    %c0_i32_0 = arith.constant 0 : i32
    return %arg0, %arg1, %c0_i32 : i32, i32, i32
  }
  func.func @transform_1(%arg0: i32, %arg1: i32) -> (i32, i32) {
    %c0_i32 = arith.constant 0 : i32
    %c0_i32_0 = arith.constant 0 : i32
    %c0_i32_1 = arith.constant 0 : i32
    return %c0_i32, %c0_i32_0 : i32, i32
  }
  func.func @transform_2(%arg0: i32, %arg1: i32) -> (i32, i32) {
    %c0_i32 = arith.constant 0 : i32
    %c0_i32_0 = arith.constant 0 : i32
    %c0_i32_1 = arith.constant 0 : i32
    return %c0_i32, %c0_i32_0 : i32, i32
  }
  func.func @transform_3(%arg0: i32, %arg1: i32) -> (i32, i32, i32) {
    %c0_i32 = arith.constant 0 : i32
    %c0_i32_0 = arith.constant 0 : i32
    return %arg0, %arg1, %c0_i32 : i32, i32, i32
  }
  func.func @transform_4(%arg0: i32, %arg1: i32) -> (i32, i32, i32, i32) {
    %c0_i32 = arith.constant 0 : i32
    %c0_i32_0 = arith.constant 0 : i32
    %c0_i32_1 = arith.constant 0 : i32
    return %arg0, %arg1, %c0_i32, %c0_i32_0 : i32, i32, i32, i32
  }
}

</mosaic_0001>

<bundles_post_ra>
// kernel: tpu_custom_call.1
= control target key start
LH: loop header
LB: loop body
LE: loop exit
PB: predicated region body
PF: predicated region fallthrough
CT: control target
= control target key end

     0   :  { %10 = vsyncpa [#allocation3], 0  ;;  %s2261_s0 = inlined_call_operand.vmem [shape: bf16[2,256,40], index: 0, kind: input, shape index: {}]   ;;  %s2262_s1 = inlined_call_operand.vmem [shape: bf16[40,256], index: 1, kind: input, shape index: {}]   ;;  %s2263_s2 = inlined_call_operand.vmem [shape: f32[1,256], index: 2, kind: input, shape index: {}]   ;;  %s2264_s3 = inlined_call_operand.hbm [shape: f32[2,256,128], index: 3, kind: output, shape index: {0}]   ;;  %s2265_s4 = inlined_call_operand.hbm [shape: f32[2,1,2,128], index: 4, kind: output, shape index: {1}]  }
   0x1   :  { %12 = vsyncpa [#allocation3 + $0x1], 0 }
   0x2   :  { %13 = vsyncpa [#allocation5], 0 }
   0x3   :  { %15 = vsyncpa [#allocation5 + $0x1], 0  ;;  %s1672_s15 = smov 0   ;;  %s1674_s16 = smov 0  }
   0x4   :  { %s1676_s17 = smov 0   ;;  %s1678_s18 = smov 0  }
   0x5   :  { %s1680_s19 = smov 0   ;;  %s1682_s20 = smov 0  }
   0x6 LB: > { %s1252_s21 = sadd.s32 4294967295, %s1640_s20   ;;  %s1253_s22 = sadd.s32 4294967294, %s1640_s20   ;;  %s1640_s20 = sphi %s1682_s20, %s21_s20   ;;  %s1636_s19 = sphi %s1680_s19, %s2272_s19   ;;  %s1632_s18 = sphi %s1678_s18, %s2271_s18   ;;  %s1628_s17 = sphi %s1676_s17, %s2270_s17   ;;  %s1624_s16 = sphi %s1674_s16, %s2269_s16   ;;  %s1620_s15 = sphi %s1672_s15, %s2268_s15  }
   0x7   : > { %s33_s23 = sadd.s32 1, %s1636_s19  ;;  %s112_s24 = sadd.s32 1, %s1628_s17 }
   0x8   : > { %p35_p0 = scmp.ge.s32.totalorder %s33_s23, 2  ;;  %p122_p1 = scmp.ne.s32.totalorder %s1628_s17, %s1624_s16 }
   0x9   : > { %p123_p2 = scmp.eq.s32.totalorder %s1252_s21, 1  ;;  %p128_p3 = scmp.ne.s32.totalorder %s1624_s16, %s1620_s15 }
   0xa   : > { %s2274_s23 = smov (%p35_p0, %s33_s23), 0  ;;  %p129_p5 = scmp.eq.s32.totalorder %s1253_s22, 1 }
   0xb   : > { %p1712_p4 = por %p123_p2, %p122_p1  ;;  %s107_s26 = ssub.s32 %s1636_s19, %s2274_s23 }
   0xc   : > { %p1256_p6 = scmp.ge.s32.totalorder %s1640_s20, 1  ;;  %p110_p7 = scmp.eq.s32.totalorder %s107_s26, 0 }
   0xd   : > { %p1719_p8 = por %p129_p5, %p128_p3  ;;  %p194_p9 = scmp.lt.s32.totalorder %s1640_s20, 3 }
   0xe   : > { %s1725_s28 = scalar_select %p110_p7, %s1628_s17, %s112_s24  }
   0xf   : > { %p195_p10 = pnand %p1256_p6, %p194_p9 }
  0x10   : > { %v1378_v0 = vld [vmem:[%s2262_s1 + $0x4] ss:$8 sps:$4 sm:$0xff] (!%p195_p10)   ;;  %v1380_v1 = vld [vmem:[%s2262_s1] ss:$8 sps:$4 sm:$0xff] (!%p195_p10)   ;;  %v1642_v2 = vmov (!%p195_p10), 0   ;;  %p230_p11 = scmp.lt.s32.totalorder (!%p195_p10), %s1632_s18, 1  ;;  %v280_v25 = vlaneseq (!%p195_p10) }
  0x11   : > { %198 = sbr.rel (%p195_p10) target bundleno = 435 (0x1b3), region = 32  ;;  %483 = vmatprep.mubr.bf16.mxu0 (!%p195_p10), %v1642_v2  ;;  %563 = vmatprep.mubr.bf16.mxu1 (!%p195_p10), %v1642_v2  ;;  %v1381_v3 = vld [vmem:[%s2262_s1 + $0x14] ss:$8 sps:$4 sm:$0xff] (!%p195_p10)   ;;  %v277_v4 = vld [vmem:[%s2262_s1 + $0x20] sm:$0xff] (!%p195_p10)  ;;  %v1383_v5 = vld [vmem:[%s2262_s1 + $0x10] ss:$8 sps:$4 sm:$0xff] (!%p195_p10)  }
  0x12   : > { %451 = vmatprep.subr.bf16.mxu0 (!%p195_p10), %v1378_v0  ;;  %1309 = vmatprep.subr.bf16.mxu1 (!%p195_p10), %v1378_v0  ;;  %v1282_v6 = vcombine.high (!%p195_p10), %v277_v4, %v277_v4  ;;  %v1281_v7 = vcombine.low (!%p195_p10), %v277_v4, %v277_v4  ;;  %vm444_vm0 = vcmask (!%p195_p10), 1043456   ;;  %vm395_vm1 = vcmask (!%p195_p10), 326656   ;;  %v278_v28 = vld [vmem:[%s2263_s2] sm:$0x3] (!%p195_p10)  ;;  %s1843_s30 = sand.u32 (!%p195_p10), 1, %s1624_s16   ;;  %s1308_s7 = sshll.u32 (!%p195_p10), %s1632_s18, 12 }
  0x13   : > { %452 = vmatpush1.bf16.msra.mxu0 (!%p195_p10), %v1380_v1  ;;  %1312 = vmatpush1.bf16.msra.mxu1 (!%p195_p10), %v1380_v1  ;;  %v281_v26 = vshrl.u32 (!%p195_p10), %v280_v25, 7  ;;  %s1257_s5 = sshll.u32 (!%p195_p10), %s1843_s30, 8  ;;  %s2126_s11 = scalar_lea.hbm (!%p195_p10), %s2264_s3, %s1308_s7 }
  0x14   : > { %453 = vmatprep.subr.bf16.mxu0 (!%p195_p10), %v1381_v3  ;;  %1310 = vmatprep.subr.bf16.mxu1 (!%p195_p10), %v1381_v3  ;;  %v446_v8 = vsel (!%p195_p10), %vm444_vm0, %v1281_v7, 0  ;;  %s1879_s6 = scalar_lea.vmem (!%p195_p10), [#allocation2], %s1257_s5  ;;  %s1106_s12 = scalar_lea.sflag (!%p195_p10), [#allocation3], %s1843_s30 }
  0x15   : > { %v286_v27 = vsub.s32 (!%p195_p10), 1, %v281_v26  ;;  %v282_v43 = vsub.s32 (!%p195_p10), 0, %v281_v26  ;;  %s1126_s8 = sshll.u32 (!%p195_p10), %s1879_s6, 4  ;;  %s2128_s8 = int_to_ptr.vmem [resolvable:$true] %s1126_s8 }
  0x17   : > { %454 = vmatpush1.bf16.msra.mxu0 (!%p195_p10), %v1383_v5  ;;  %1313 = vmatpush1.bf16.msra.mxu1 (!%p195_p10), %v1383_v5  ;;  %v1800_v29 = vrot.slane (!%p195_p10), %v278_v28, %v286_v27  ;;  %v1810_v51 = vrot.slane (!%p195_p10), %v278_v28, %v282_v43 }
  0x18   : > { %s231_s13 = scalar_select %p230_p11, %s1632_s18, 1  ;;  %1283 = vmatprep.subr.msk.bf16.mxu0 %vm444_vm0, %v1282_v6  ;;  %1311 = vmatprep.subr.msk.bf16.mxu1 %vm444_vm0, %v1282_v6 }
  0x1a   : > { %s1307_s14 = sshll.u32 %s231_s13, 7  ;;  %s1530_s13 = scalar_lea.vmem %s2128_s8, 4096 }
  0x1b   : > { %s1749_s24 = scalar_lea.vmem %s2261_s0, %s1307_s14  ;;  %456 = vmatpush1.bf16.msra.mxu0 %v446_v8  ;;  %1314 = vmatpush1.bf16.msra.mxu1 %v446_v8  ;;  %p1531_p12 = scmp.ne.s32.totalorder %s2128_s8, %s1530_s13 }
  0x1c   : > { %v1386_v9 = vld [vmem:[%s1749_s24] sm:$0xff]   ;;  %v1388_v11 = vld [vmem:[%s1749_s24 + $0x8] sm:$0xff]   ;;  %v1390_v13 = vld [vmem:[%s1749_s24 + $0x10] sm:$0xff]   ;;  %s1643_s14 = smov [#allocation2]  }
  0x1d   : > { %v1387_v10 = vld [vmem:[%s1749_s24 + $0x40] sm:$0xff]   ;;  %v1389_v12 = vld [vmem:[%s1749_s24 + $0x48] sm:$0xff]   ;;  %v1391_v14 = vld [vmem:[%s1749_s24 + $0x50] sm:$0xff]   ;;  %p1532_p13 = pnand %p1531_p12, %p1712_p4  ;;  %s1534_s21 = sshll.u32 %s1643_s14, 4  ;;  %s1535_s21 = int_to_ptr.vmem [resolvable:$false] %s1534_s21 }
  0x1e   : > { %1284 = vmatmul.mubr.msk.bf16.vlgmr.msra.gmra.mrb[0].mxu0 %vm395_vm1, %v1386_v9  ;;  %1292 = vmatmul.mubr.msk.bf16.vlgmr.msra.gmra.mrb[0].mxu1 %vm395_vm1, %v1387_v10  ;;  %v1392_v15 = vld [vmem:[%s1749_s24 + $0x18] sm:$0xff]   ;;  %v1394_v17 = vld [vmem:[%s1749_s24 + $0x20] sm:$0xff]   ;;  %v1396_v19 = vld [vmem:[%s1749_s24 + $0x28] sm:$0xff]   ;;  %s1536_s22 = scalar_lea.vmem %s1535_s21, 8192  ;;  %p1537_p1 = scmp.lt.s32.totalorder %s2128_s8, %s1535_s21 }
  0x1f   : > { %493 = vmatprep.mubr.bf16.mxu0 %v1642_v2  ;;  %573 = vmatprep.mubr.bf16.mxu1 %v1642_v2  ;;  %v1393_v16 = vld [vmem:[%s1749_s24 + $0x58] sm:$0xff]   ;;  %v1395_v18 = vld [vmem:[%s1749_s24 + $0x60] sm:$0xff]   ;;  %v1397_v20 = vld [vmem:[%s1749_s24 + $0x68] sm:$0xff]   ;;  %p1533_p0 = pneg %p1532_p13  ;;  %p1538_p2 = scmp.lt.s32.totalorder %s1536_s22, %s1530_s13 }
  0x20   : > { %v1398_v21 = vld [vmem:[%s1749_s24 + $0x30] sm:$0xff]   ;;  %v1400_v23 = vld [vmem:[%s1749_s24 + $0x38] sm:$0xff]  }
  0x21   : > { %v1399_v22 = vld [vmem:[%s1749_s24 + $0x70] sm:$0xff]   ;;  %v1401_v24 = vld [vmem:[%s1749_s24 + $0x78] sm:$0xff]   ;;  %p1539_p3 = por %p1538_p2, %p1537_p1 }
  0x23   : > { %p1540_p5 = pnand %p1539_p3, %p1533_p0 }
  0x26   : > { %1285 = vmatmul.mubr.msk.bf16.gmra.mrb[4].mxu0 %vm395_vm1, %v1388_v11  ;;  %1293 = vmatmul.mubr.msk.bf16.gmra.mrb[4].mxu1 %vm395_vm1, %v1389_v12 }
  0x27   : > { %503 = vmatprep.mubr.bf16.mxu0 %v1642_v2  ;;  %583 = vmatprep.mubr.bf16.mxu1 %v1642_v2 }
  0x2e   : > { %1286 = vmatmul.mubr.msk.bf16.gmra.mrb[8].mxu0 %vm395_vm1, %v1390_v13  ;;  %1294 = vmatmul.mubr.msk.bf16.gmra.mrb[8].mxu1 %vm395_vm1, %v1391_v14 }
  0x2f   : > { %513 = vmatprep.mubr.bf16.mxu0 %v1642_v2  ;;  %593 = vmatprep.mubr.bf16.mxu1 %v1642_v2 }
  0x36   : > { %1287 = vmatmul.mubr.msk.bf16.gmra.mrb[12].mxu0 %vm395_vm1, %v1392_v15  ;;  %1295 = vmatmul.mubr.msk.bf16.gmra.mrb[12].mxu1 %vm395_vm1, %v1393_v16 }
  0x37   : > { %523 = vmatprep.mubr.bf16.mxu0 %v1642_v2  ;;  %603 = vmatprep.mubr.bf16.mxu1 %v1642_v2 }
  0x3e   : > { %1288 = vmatmul.mubr.msk.bf16.gmra.mrb[16].mxu0 %vm395_vm1, %v1394_v17  ;;  %1296 = vmatmul.mubr.msk.bf16.gmra.mrb[16].mxu1 %vm395_vm1, %v1395_v18 }
  0x3f   : > { %533 = vmatprep.mubr.bf16.mxu0 %v1642_v2  ;;  %613 = vmatprep.mubr.bf16.mxu1 %v1642_v2 }
  0x46   : > { %1289 = vmatmul.mubr.msk.bf16.gmra.mrb[20].mxu0 %vm395_vm1, %v1396_v19  ;;  %1297 = vmatmul.mubr.msk.bf16.gmra.mrb[20].mxu1 %vm395_vm1, %v1397_v20 }
  0x47   : > { %543 = vmatprep.mubr.bf16.mxu0 %v1642_v2  ;;  %623 = vmatprep.mubr.bf16.mxu1 %v1642_v2 }
  0x4e   : > { %1290 = vmatmul.mubr.msk.bf16.gmra.mrb[24].mxu0 %vm395_vm1, %v1398_v21  ;;  %1298 = vmatmul.mubr.msk.bf16.gmra.mrb[24].mxu1 %vm395_vm1, %v1399_v22 }
  0x4f   : > { %553 = vmatprep.mubr.bf16.mxu0 %v1642_v2  ;;  %633 = vmatprep.mubr.bf16.mxu1 %v1642_v2 }
  0x56   : > { %1291 = vmatmul.mubr.msk.bf16.gmra.mrb[28].mxu0 %vm395_vm1, %v1400_v23  ;;  %1299 = vmatmul.mubr.msk.bf16.gmra.mrb[28].mxu1 %vm395_vm1, %v1401_v24 }
  0xf1   : > { %v485_v30 = vpop.f32.mrb[0].mxu0  ;;  %v565_v31 = vpop.f32.mrb[0].mxu1 }
  0xf2   : > { %v487_v32 = vpop.f32.mrb[1].mxu0  ;;  %v567_v33 = vpop.f32.mrb[1].mxu1  ;;  %v486_v0 = vadd.f32 %v485_v30, %v1810_v51  ;;  %v566_v4 = vadd.f32 %v565_v31, %v1810_v51 }
  0xf3   : > { %v488_v34 = vadd.f32 %v487_v32, %v1800_v29  ;;  %v489_v35 = vpop.f32.mrb[2].mxu0  ;;  %v568_v36 = vadd.f32 %v567_v33, %v1800_v29  ;;  %v569_v37 = vpop.f32.mrb[2].mxu1 }
  0xf4   : > { %v491_v38 = vpop.f32.mrb[3].mxu0  ;;  %v571_v39 = vpop.f32.mrb[3].mxu1  ;;  %v676_v10 = vmul.f32 0.2, %v486_v0  ;;  %vm644_vm2 = vcmp.ge.f32.partialorder %v486_v0, 0.0  ;;  %v490_v15 = vadd.f32 %v489_v35, %v1810_v51  ;;  %vm660_vm3 = vcmp.ge.f32.partialorder %v566_v4, 0.0 }
  0xf5   : > { %v740_v40 = vsub.f32 0.0, %v488_v34  ;;  %v492_v41 = vadd.f32 %v491_v38, %v1800_v29  ;;  %v756_v42 = vsub.f32 0.0, %v568_v36  ;;  %v572_v47 = vadd.f32 %v571_v39, %v1800_v29 }
  0xf6   : > { %v570_v21 = vadd.f32 %v569_v37, %v1810_v51  ;;  %v708_v30 = vsel %vm644_vm2, %v486_v0, %v676_v10  ;;  %v692_v31 = vmul.f32 0.2, %v566_v4  ;;  %vm645_vm4 = vcmp.ge.f32.partialorder %v490_v15, 0.0 }
  0xf7   : > { %v772_v44 = vmul.f32 1.442695, %v740_v40  ;;  %v741_v45 = vsub.f32 0.0, %v492_v41  ;;  %v804_v46 = vmul.f32 1.442695, %v756_v42  ;;  %v757_v52 = vsub.f32 0.0, %v572_v47 }
  0xf8   : > { %v677_v33 = vmul.f32 0.2, %v490_v15  ;;  %v693_v36 = vmul.f32 0.2, %v570_v21  ;;  %vm661_vm5 = vcmp.ge.f32.partialorder %v570_v21, 0.0  ;;  %v724_v43 = vsel %vm660_vm3, %v566_v4, %v692_v31 }
  0xf9   : > { %1402 = vpow2.f32 %v772_v44  ;;  %v774_v48 = vmul.f32 1.442695, %v741_v45  ;;  %v1806_v49 = vpop.f32.mrb[4].mxu0  ;;  %v1808_v50 = vpop.f32.mrb[4].mxu1  ;;  %v806_v59 = vmul.f32 1.442695, %v757_v52 }
  0xfa   : > { %1404 = vpow2.f32 %v804_v46  ;;  %v497_v53 = vpop.f32.mrb[5].mxu0  ;;  %v577_v54 = vpop.f32.mrb[5].mxu1  ;;  %v496_v37 = vadd.f32 %v1806_v49, %v1810_v51  ;;  %v576_v44 = vadd.f32 %v1808_v50, %v1810_v51  ;;  %v709_v49 = vsel %vm645_vm4, %v490_v15, %v677_v33 }
  0xfb   : > { %1406 = vpow2.f32 %v774_v48  ;;  %v498_v55 = vadd.f32 %v497_v53, %v1800_v29  ;;  %v1813_v56 = vpop.f32.mrb[6].mxu0  ;;  %v578_v57 = vadd.f32 %v577_v54, %v1800_v29  ;;  %v1816_v58 = vpop.f32.mrb[6].mxu1 }
  0xfc   : > { %v501_v60 = vpop.f32.mrb[7].mxu0  ;;  %v581_v63 = vpop.f32.mrb[7].mxu1  ;;  %1408 = vpow2.f32 %v806_v59  ;;  %v678_v50 = vmul.f32 0.2, %v496_v37  ;;  %vm646_vm6 = vcmp.ge.f32.partialorder %v496_v37, 0.0  ;;  %vm662_vm7 = vcmp.ge.f32.partialorder %v576_v44, 0.0 }
  0xfd   : > { %v742_v61 = vsub.f32 0.0, %v498_v55  ;;  %v502_v62 = vadd.f32 %v501_v60, %v1800_v29  ;;  %v758_v3 = vsub.f32 0.0, %v578_v57  ;;  %v582_v5 = vadd.f32 %v581_v63, %v1800_v29 }
  0xfe   : > { %v1855_v57 = vsel %vm661_vm5, %v570_v21, %v693_v36 }
  0xff   : > { %v776_v1 = vmul.f32 1.442695, %v742_v61  ;;  %v743_v2 = vsub.f32 0.0, %v502_v62  ;;  %v808_v7 = vmul.f32 1.442695, %v758_v3  ;;  %v759_v11 = vsub.f32 0.0, %v582_v5 }
 0x100   : > { %v500_v62 = vadd.f32 %v1813_v56, %v1810_v51  ;;  %v694_v3 = vmul.f32 0.2, %v576_v44  ;;  %v710_v56 = vsel %vm646_vm6, %v496_v37, %v678_v50 }
 0x101   : > { %1410 = vpow2.f32 %v776_v1  ;;  %v778_v6 = vmul.f32 1.442695, %v743_v2  ;;  %v1822_v8 = vpop.f32.mrb[8].mxu0  ;;  %v1824_v9 = vpop.f32.mrb[8].mxu1  ;;  %v810_v26 = vmul.f32 1.442695, %v759_v11 }
 0x102   : > { %v507_v12 = vpop.f32.mrb[9].mxu0  ;;  %v587_v13 = vpop.f32.mrb[9].mxu1  ;;  %vm647_vm8 = vcmp.ge.f32.partialorder %v500_v62, 0.0  ;;  %v679_v15 = vmul.f32 0.2, %v500_v62 }
 0x103   : > { %v1403_v14 = vpop.eup %1402  ;;  %1412 = vpow2.f32 %v778_v6  ;;  %v508_v16 = vadd.f32 %v507_v12, %v1800_v29  ;;  %v1828_v17 = vpop.f32.mrb[10].mxu0  ;;  %v588_v28 = vadd.f32 %v587_v13, %v1800_v29 }
 0x104   : > { %v1830_v18 = vpop.f32.mrb[10].mxu1  ;;  %v1405_v19 = vpop.eup %1404  ;;  %v836_v20 = vadd.f32 1.0, %v1403_v14  ;;  %1414 = vpow2.f32 %v808_v7  ;;  %v580_v7 = vadd.f32 %v1816_v58, %v1810_v51 }
 0x105   : > { %v511_v22 = vpop.f32.mrb[11].mxu0  ;;  %v591_v23 = vpop.f32.mrb[11].mxu1  ;;  %v852_v25 = vadd.f32 1.0, %v1405_v19  ;;  %v744_v27 = vsub.f32 0.0, %v508_v16  ;;  %v760_v40 = vsub.f32 0.0, %v588_v28 }
 0x106   : > { %v1407_v24 = vpop.eup %1406  ;;  %1416 = vrcp.f32 %v836_v20  ;;  %v512_v38 = vadd.f32 %v511_v22, %v1800_v29  ;;  %v592_v53 = vadd.f32 %v591_v23, %v1800_v29  ;;  %vm663_vm9 = vcmp.ge.f32.partialorder %v580_v7, 0.0 }
 0x107   : > { %v837_v32 = vadd.f32 1.0, %v1407_v24  ;;  %1418 = vrcp.f32 %v852_v25  ;;  %v780_v34 = vmul.f32 1.442695, %v744_v27  ;;  %v1409_v35 = vpop.eup %1408  ;;  %v812_v52 = vmul.f32 1.442695, %v760_v40 }
 0x108   : > { %v853_v39 = vadd.f32 1.0, %v1409_v35  ;;  %v745_v45 = vsub.f32 0.0, %v512_v38  ;;  %v761_v63 = vsub.f32 0.0, %v592_v53  ;;  %v726_v27 = vsel %vm662_vm7, %v576_v44, %v694_v3 }
 0x109   : > { %1420 = vrcp.f32 %v837_v32  ;;  %v1838_v41 = vpop.f32.mrb[12].mxu0  ;;  %v1840_v42 = vpop.f32.mrb[12].mxu1  ;;  %v695_v33 = vmul.f32 0.2, %v580_v7  ;;  %v1892_v35 = vadd.f32 %v1822_v8, %v1810_v51 }
 0x10a   : > { %1422 = vpow2.f32 %v810_v26  ;;  %v517_v46 = vpop.f32.mrb[13].mxu0  ;;  %v597_v47 = vpop.f32.mrb[13].mxu1  ;;  %v782_v60 = vmul.f32 1.442695, %v745_v45  ;;  %v814_v10 = vmul.f32 1.442695, %v761_v63 }
 0x10b   : > { %1424 = vpow2.f32 %v780_v34  ;;  %v1411_v48 = vpop.eup %1410  ;;  %v1850_v54 = vpop.f32.mrb[14].mxu0  ;;  %v518_v5 = vadd.f32 %v517_v46, %v1800_v29  ;;  %v598_v28 = vadd.f32 %v597_v47, %v1800_v29  ;;  %v711_v46 = vsel %vm647_vm8, %v500_v62, %v679_v15 }
 0x10c   : > { %1426 = vrcp.f32 %v853_v39  ;;  %v1852_v55 = vpop.f32.mrb[14].mxu1  ;;  %v838_v59 = vadd.f32 1.0, %v1411_v48  ;;  %v521_v0 = vpop.f32.mrb[15].mxu0  ;;  %v727_v50 = vsel %vm663_vm9, %v580_v7, %v695_v33  ;;  %vm648_vm10 = vcmp.ge.f32.partialorder %v1892_v35, 0.0 }
 0x10d   : > { %v1413_v61 = vpop.eup %1412  ;;  %1428 = vpow2.f32 %v812_v52  ;;  %v1860_v1 = vpop.f32.mrb[15].mxu1  ;;  %v746_v12 = vsub.f32 0.0, %v518_v5  ;;  %v522_v22 = vadd.f32 %v521_v0, %v1800_v29  ;;  %v762_v52 = vsub.f32 0.0, %v598_v28 }
 0x10e   : > { %v1415_v2 = vpop.eup %1414  ;;  %1430 = vrcp.f32 %v838_v59  ;;  %v839_v4 = vadd.f32 1.0, %v1413_v61  ;;  %v680_v63 = vmul.f32 0.2, %v1892_v35 }
 0x10f   : > { %v854_v6 = vadd.f32 1.0, %v1415_v2  ;;  %1432 = vpow2.f32 %v782_v60  ;;  %v784_v21 = vmul.f32 1.442695, %v746_v12  ;;  %v747_v8 = vsub.f32 0.0, %v522_v22 }
 0x110   : > { %v1417_v11 = vpop.eup %1416  ;;  %1434 = vrcp.f32 %v839_v4  ;;  %v602_v60 = vadd.f32 %v1860_v1, %v1800_v29  ;;  %v816_v4 = vmul.f32 1.442695, %v762_v52 }
 0x111   : > { %v1419_v13 = vpop.eup %1418  ;;  %v932_v14 = vmul.f32 %v1417_v11, %v708_v30  ;;  %1436 = vrcp.f32 %v854_v6  ;;  %v1866_v16 = vpop.f32.mrb[16].mxu0 }
 0x112   : > { %v1868_v19 = vpop.f32.mrb[16].mxu1  ;;  %v1870_v58 = vmul.f32 %v1419_v13, %v724_v43  ;;  %1438 = vpow2.f32 %v814_v10  ;;  %v1873_v23 = vpop.f32.mrb[17].mxu0  ;;  %v763_v5 = vsub.f32 0.0, %v602_v60 }
 0x113   : > { %v1421_v20 = vpop.eup %1420  ;;  %v1875_v24 = vpop.f32.mrb[17].mxu1  ;;  %964 = vst [vmem:[%s1879_s6] sm:$0xff] %v932_v14  ;;  %1440 = vpow2.f32 %v784_v21  ;;  %v1033_v39 = vmul.f32 %v932_v14, %v932_v14 }
 0x114   : > { %v1423_v25 = vpop.eup %1422  ;;  %v933_v26 = vmul.f32 %v1421_v20, %v709_v49  ;;  %v1884_v30 = vpop.f32.mrb[18].mxu0  ;;  %980 = vst [vmem:[%s1879_s6 + $0x80] sm:$0xff] %v1870_v58  ;;  %v1905_v49 = vadd.f32 %v1824_v9, %v1810_v51  ;;  %v510_v9 = vadd.f32 %v1828_v17, %v1810_v51  ;;  %v818_v15 = vmul.f32 1.442695, %v763_v5 }
 0x115   : > { %v1886_v31 = vpop.f32.mrb[18].mxu1  ;;  %v1425_v32 = vpop.eup %1424  ;;  %v855_v34 = vadd.f32 1.0, %v1423_v25 }
 0x116   : > { %v1894_v36 = vpop.f32.mrb[19].mxu0  ;;  %v1896_v37 = vpop.f32.mrb[19].mxu1  ;;  %965 = vst [vmem:[%s1879_s6 + $0x8] sm:$0xff] %v933_v26  ;;  %v996_v40 = vadd.f32 %v933_v26, %v932_v14  ;;  %v1034_v43 = vmul.f32 %v933_v26, %v933_v26  ;;  %v840_v44 = vadd.f32 1.0, %v1425_v32  ;;  %vm664_vm11 = vcmp.ge.f32.partialorder %v1905_v49, 0.0 }
 0x117   : > { %v1427_v38 = vpop.eup %1426  ;;  %1442 = vrcp.f32 %v855_v34  ;;  %v696_v34 = vmul.f32 0.2, %v1905_v49  ;;  %vm649_vm12 = vcmp.ge.f32.partialorder %v510_v9, 0.0 }
 0x118   : > { %v1900_v45 = vmul.f32 %v1427_v38, %v1855_v57  ;;  %v1429_v47 = vpop.eup %1428  ;;  %v1065_v48 = vadd.f32 %v1034_v43, %v1033_v39  ;;  %1444 = vrcp.f32 %v840_v44  ;;  %v786_v57 = vmul.f32 1.442695, %v747_v8 }
 0x119   : > { %v1431_v53 = vpop.eup %1430  ;;  %v856_v59 = vadd.f32 1.0, %v1429_v47  ;;  %v1916_v0 = vpop.f32.mrb[20].mxu0  ;;  %v590_v38 = vadd.f32 %v1830_v18, %v1810_v51  ;;  %v528_v43 = vadd.f32 %v1873_v23, %v1800_v29  ;;  %v516_v8 = vadd.f32 %v1838_v41, %v1810_v51 }
 0x11a   : > { %981 = vst [vmem:[%s1879_s6 + $0x88] sm:$0xff] %v1900_v45  ;;  %v1433_v61 = vpop.eup %1432  ;;  %v934_v62 = vmul.f32 %v1431_v53, %v710_v56  ;;  %v1918_v6 = vpop.f32.mrb[21].mxu0  ;;  %v532_v23 = vadd.f32 %v1894_v36, %v1800_v29 }
 0x11b   : > { %v1435_v2 = vpop.eup %1434  ;;  %v841_v3 = vadd.f32 1.0, %v1433_v61  ;;  %1446 = vrcp.f32 %v856_v59  ;;  %v1920_v7 = vpop.f32.mrb[20].mxu1  ;;  %v697_v60 = vmul.f32 0.2, %v590_v38  ;;  %vm665_vm13 = vcmp.ge.f32.partialorder %v590_v38, 0.0 }
 0x11c   : > { %v1437_v1 = vpop.eup %1436  ;;  %966 = vst [vmem:[%s1879_s6 + $0x10] sm:$0xff] %v934_v62  ;;  %v997_v10 = vadd.f32 %v996_v40, %v934_v62  ;;  %v1035_v11 = vmul.f32 %v934_v62, %v934_v62  ;;  %v935_v56 = vmul.f32 %v1435_v2, %v711_v46  ;;  %1448 = vpow2.f32 %v786_v57  ;;  %v1923_v12 = vpop.f32.mrb[22].mxu0 }
 0x11d   : > { %v1925_v17 = vpop.f32.mrb[21].mxu1  ;;  %v1439_v13 = vpop.eup %1438  ;;  %v1927_v14 = vmul.f32 %v1437_v1, %v726_v27  ;;  %1450 = vrcp.f32 %v841_v3  ;;  %v681_v27 = vmul.f32 0.2, %v510_v9  ;;  %v712_v46 = vsel %vm648_vm10, %v1892_v35, %v680_v63 }
 0x11e   : > { %v1930_v20 = vpop.f32.mrb[23].mxu0  ;;  %v1932_v21 = vpop.f32.mrb[22].mxu1  ;;  %v1066_v22 = vadd.f32 %v1065_v48, %v1035_v11  ;;  %967 = vst [vmem:[%s1879_s6 + $0x18] sm:$0xff] %v935_v56  ;;  %v998_v25 = vadd.f32 %v997_v10, %v935_v56  ;;  %v1036_v26 = vmul.f32 %v935_v56, %v935_v56  ;;  %v857_v28 = vadd.f32 1.0, %v1439_v13 }
 0x11f   : > { %v1935_v32 = vpop.f32.mrb[23].mxu1  ;;  %v1441_v33 = vpop.eup %1440  ;;  %982 = vst [vmem:[%s1879_s6 + $0x90] sm:$0xff] %v1927_v14  ;;  %1452 = vpow2.f32 %v816_v4  ;;  %v748_v48 = vsub.f32 0.0, %v528_v43  ;;  %v728_v35 = vsel %vm664_vm11, %v1905_v49, %v696_v34  ;;  %v749_v62 = vsub.f32 0.0, %v532_v23 }
 0x120   : > { %v1067_v39 = vadd.f32 %v1066_v22, %v1036_v26  ;;  %1454 = vrcp.f32 %v857_v28  ;;  %v842_v40 = vadd.f32 1.0, %v1441_v33  ;;  %v608_v49 = vadd.f32 %v1875_v24, %v1800_v29 }
 0x121   : > { %v1443_v44 = vpop.eup %1442  ;;  %1456 = vpow2.f32 %v818_v15  ;;  %v1953_v52 = vpop.f32.mrb[24].mxu0  ;;  %v788_v61 = vmul.f32 1.442695, %v748_v48  ;;  %vm650_vm14 = vcmp.ge.f32.partialorder %v516_v8, 0.0  ;;  %v790_v10 = vmul.f32 1.442695, %v749_v62 }
 0x122   : > { %v1445_v47 = vpop.eup %1444  ;;  %v1949_v18 = vmul.f32 %v1443_v44, %v727_v50  ;;  %1458 = vrcp.f32 %v842_v40  ;;  %v1955_v53 = vpop.f32.mrb[24].mxu1  ;;  %v713_v50 = vsel %vm649_vm12, %v510_v9, %v681_v27  ;;  %v682_v15 = vmul.f32 0.2, %v516_v8 }
 0x123   : > { %v936_v59 = vmul.f32 %v1445_v47, %v712_v46  ;;  %v1960_v41 = vpop.f32.mrb[25].mxu0  ;;  %v1962_v57 = vpop.f32.mrb[25].mxu1  ;;  %1460 = vpow2.f32 %v788_v61  ;;  %v729_v24 = vsel %vm665_vm13, %v590_v38, %v697_v60  ;;  %v612_v28 = vadd.f32 %v1896_v37, %v1800_v29 }
 0x124   : > { %983 = vst [vmem:[%s1879_s6 + $0x98] sm:$0xff] %v1949_v18  ;;  %v1966_v36 = vpop.f32.mrb[26].mxu0  ;;  %v1973_v5 = vpop.f32.mrb[26].mxu1  ;;  %1462 = vpow2.f32 %v790_v10  ;;  %v520_v27 = vadd.f32 %v1850_v54, %v1810_v51  ;;  %v596_v34 = vadd.f32 %v1840_v42, %v1810_v51  ;;  %v714_v54 = vsel %vm650_vm14, %v516_v8, %v682_v15 }
 0x125   : > { %v1447_v63 = vpop.eup %1446  ;;  %968 = vst [vmem:[%s1879_s6 + $0x20] sm:$0xff] %v936_v59  ;;  %v999_v2 = vadd.f32 %v998_v25, %v936_v59  ;;  %v1037_v3 = vmul.f32 %v936_v59, %v936_v59  ;;  %v1971_v4 = vpop.f32.mrb[27].mxu0  ;;  %v764_v25 = vsub.f32 0.0, %v608_v49  ;;  %v765_v47 = vsub.f32 0.0, %v612_v28 }
 0x126   : > { %v1449_v1 = vpop.eup %1448  ;;  %v1975_v9 = vmul.f32 %v1447_v63, %v728_v35  ;;  %v1977_v11 = vpop.f32.mrb[27].mxu1  ;;  %v600_v42 = vadd.f32 %v1852_v55, %v1810_v51  ;;  %vm651_vm15 = vcmp.ge.f32.partialorder %v520_v27, 0.0  ;;  %v683_v55 = vmul.f32 0.2, %v520_v27 }
 0x127   : > { %v1451_v56 = vpop.eup %1450  ;;  %v1068_v13 = vadd.f32 %v1067_v39, %v1037_v3  ;;  %v843_v22 = vadd.f32 1.0, %v1449_v1  ;;  %v820_v39 = vmul.f32 1.442695, %v764_v25  ;;  %v822_v62 = vmul.f32 1.442695, %v765_v47 }
 0x128   : > { %v937_v26 = vmul.f32 %v1451_v56, %v713_v50  ;;  %984 = vst [vmem:[%s1879_s6 + $0xa0] sm:$0xff] %v1975_v9  ;;  %vm666_vm0 = vcmp.ge.f32.partialorder %v596_v34, 0.0  ;;  %v698_v1 = vmul.f32 0.2, %v596_v34  ;;  %v538_v10 = vadd.f32 %v1918_v6, %v1800_v29 }
 0x129   : > { %v1453_v33 = vpop.eup %1452  ;;  %1464 = vrcp.f32 %v843_v22  ;;  %v1989_v38 = vpop.f32.mrb[28].mxu0  ;;  %v699_v15 = vmul.f32 0.2, %v600_v42  ;;  %vm667_vm1 = vcmp.ge.f32.partialorder %v600_v42, 0.0  ;;  %v526_v6 = vadd.f32 %v1866_v16, %v1810_v51 }
 0x12a   : > { %v1455_v40 = vpop.eup %1454  ;;  %969 = vst [vmem:[%s1879_s6 + $0x28] sm:$0xff] %v937_v26  ;;  %v1000_v43 = vadd.f32 %v999_v2, %v937_v26  ;;  %v1038_v44 = vmul.f32 %v937_v26, %v937_v26  ;;  %v858_v46 = vadd.f32 1.0, %v1453_v33  ;;  %v1991_v48 = vpop.f32.mrb[28].mxu1  ;;  %1466 = vpow2.f32 %v820_v39 }
 0x12b   : > { %v1457_v37 = vpop.eup %1456  ;;  %v1993_v23 = vmul.f32 %v1455_v40, %v729_v24  ;;  %v1998_v59 = vpop.f32.mrb[29].mxu0  ;;  %v750_v25 = vsub.f32 0.0, %v538_v10  ;;  %v715_v24 = vsel %vm651_vm15, %v520_v27, %v683_v55  ;;  %v542_v33 = vadd.f32 %v1930_v20, %v1800_v29 }
 0x12c   : > { %v2000_v35 = vpop.f32.mrb[29].mxu1  ;;  %v1459_v50 = vpop.eup %1458  ;;  %v1069_v60 = vadd.f32 %v1068_v13, %v1038_v44  ;;  %1468 = vrcp.f32 %v858_v46  ;;  %v859_v61 = vadd.f32 1.0, %v1457_v37  ;;  %v730_v40 = vsel %vm666_vm0, %v596_v34, %v698_v1 }
 0x12d   : > { %v2002_v63 = vpop.f32.mrb[30].mxu0  ;;  %v2004_v2 = vpop.f32.mrb[30].mxu1  ;;  %985 = vst [vmem:[%s1879_s6 + $0xa8] sm:$0xff] %v1993_v23  ;;  %v938_v8 = vmul.f32 %v1459_v50, %v714_v54  ;;  %v618_v44 = vadd.f32 %v1925_v17, %v1800_v29  ;;  %v731_v47 = vsel %vm667_vm1, %v600_v42, %v699_v15  ;;  %v751_v27 = vsub.f32 0.0, %v542_v33 }
 0x12e   : > { %v2008_v3 = vpop.f32.mrb[31].mxu0  ;;  %v2010_v49 = vpop.f32.mrb[31].mxu1  ;;  %1470 = vrcp.f32 %v859_v61  ;;  %v530_v20 = vadd.f32 %v1884_v30, %v1810_v51  ;;  %v606_v16 = vadd.f32 %v1868_v19, %v1810_v51  ;;  %v622_v17 = vadd.f32 %v1935_v32, %v1800_v29 }
 0x12f   : > { %970 = vst [vmem:[%s1879_s6 + $0x30] sm:$0xff] %v938_v8  ;;  %v1001_v56 = vadd.f32 %v1000_v43, %v938_v8  ;;  %v1039_v13 = vmul.f32 %v938_v8, %v938_v8  ;;  %1472 = vpow2.f32 %v822_v62  ;;  %v1461_v22 = vpop.eup %1460  ;;  %v792_v43 = vmul.f32 1.442695, %v750_v25 }
 0x130   : > { %v844_v28 = vadd.f32 1.0, %v1461_v22  ;;  %v1463_v39 = vpop.eup %1462  ;;  %v766_v50 = vsub.f32 0.0, %v618_v44  ;;  %v610_v30 = vadd.f32 %v1886_v31, %v1810_v51  ;;  %v767_v10 = vsub.f32 0.0, %v622_v17 }
 0x131   : > { %v1070_v26 = vadd.f32 %v1069_v60, %v1039_v13  ;;  %v845_v37 = vadd.f32 1.0, %v1463_v39  ;;  %v794_v60 = vmul.f32 1.442695, %v751_v27  ;;  %vm652_vm2 = vcmp.ge.f32.partialorder %v526_v6, 0.0 }
 0x132   : > { %1474 = vrcp.f32 %v844_v28  ;;  %v824_v55 = vmul.f32 1.442695, %v766_v50  ;;  %v548_v32 = vadd.f32 %v1960_v41, %v1800_v29  ;;  %v684_v22 = vmul.f32 0.2, %v526_v6 }
 0x133   : > { %v1465_v46 = vpop.eup %1464  ;;  %1476 = vpow2.f32 %v792_v43  ;;  %v826_v25 = vmul.f32 1.442695, %v767_v10  ;;  %vm653_vm3 = vcmp.ge.f32.partialorder %v530_v20, 0.0  ;;  %v685_v31 = vmul.f32 0.2, %v530_v20 }
 0x134   : > { %v939_v54 = vmul.f32 %v1465_v46, %v715_v24  ;;  %v1467_v34 = vpop.eup %1466  ;;  %1478 = vrcp.f32 %v845_v37  ;;  %v752_v28 = vsub.f32 0.0, %v548_v32  ;;  %vm668_vm4 = vcmp.ge.f32.partialorder %v606_v16, 0.0 }
 0x135   : > { %v860_v8 = vadd.f32 1.0, %v1467_v34  ;;  %1480 = vpow2.f32 %v794_v60  ;;  %v701_v33 = vmul.f32 0.2, %v610_v30  ;;  %vm669_vm5 = vcmp.ge.f32.partialorder %v610_v30, 0.0 }
 0x136   : > { %v1469_v61 = vpop.eup %1468  ;;  %971 = vst [vmem:[%s1879_s6 + $0x38] sm:$0xff] %v939_v54  ;;  %v1002_v42 = vadd.f32 %v1001_v56, %v939_v54  ;;  %v1040_v62 = vmul.f32 %v939_v54, %v939_v54  ;;  %v796_v41 = vmul.f32 1.442695, %v752_v28  ;;  %v552_v39 = vadd.f32 %v1971_v4, %v1800_v29 }
 0x137   : > { %v2030_v1 = vmul.f32 %v1469_v61, %v730_v40  ;;  %1482 = vrcp.f32 %v860_v8  ;;  %v716_v43 = vsel %vm652_vm2, %v526_v6, %v684_v22  ;;  %v628_v37 = vadd.f32 %v1962_v57, %v1800_v29 }
 0x138   : > { %v1471_v19 = vpop.eup %1470  ;;  %v1071_v13 = vadd.f32 %v1070_v26, %v1040_v62  ;;  %1484 = vpow2.f32 %v824_v55  ;;  %v700_v26 = vmul.f32 0.2, %v606_v16  ;;  %v717_v54 = vsel %vm653_vm3, %v530_v20, %v685_v31 }
 0x139   : > { %v1473_v15 = vpop.eup %1472  ;;  %986 = vst [vmem:[%s1879_s6 + $0xb0] sm:$0xff] %v2030_v1  ;;  %v2038_v56 = vmul.f32 %v1471_v19, %v731_v47  ;;  %1486 = vpow2.f32 %v826_v25  ;;  %v753_v47 = vsub.f32 0.0, %v552_v39  ;;  %v733_v34 = vsel %vm669_vm5, %v610_v30, %v701_v33 }
 0x13a   : > { %v861_v24 = vadd.f32 1.0, %v1473_v15  ;;  %v732_v50 = vsel %vm668_vm4, %v606_v16, %v700_v26  ;;  %v536_v8 = vadd.f32 %v1916_v0, %v1810_v51  ;;  %v540_v57 = vadd.f32 %v1923_v12, %v1810_v51 }
 0x13b   : > { %987 = vst [vmem:[%s1879_s6 + $0xb8] sm:$0xff] %v2038_v56  ;;  %v798_v6 = vmul.f32 1.442695, %v753_v47  ;;  %v768_v55 = vsub.f32 0.0, %v628_v37  ;;  %v616_v15 = vadd.f32 %v1920_v7, %v1810_v51  ;;  %v632_v12 = vadd.f32 %v1977_v11, %v1800_v29 }
 0x13c   : > { %1488 = vrcp.f32 %v861_v24  ;;  %v1475_v40 = vpop.eup %1474  ;;  %v558_v24 = vadd.f32 %v1998_v59, %v1800_v29  ;;  %vm654_vm6 = vcmp.ge.f32.partialorder %v536_v8, 0.0  ;;  %vm655_vm7 = vcmp.ge.f32.partialorder %v540_v57, 0.0 }
 0x13d   : > { %v1477_v44 = vpop.eup %1476  ;;  %v940_v46 = vmul.f32 %v1475_v40, %v716_v43  ;;  %1490 = vpow2.f32 %v796_v41  ;;  %v828_v0 = vmul.f32 1.442695, %v768_v55  ;;  %v769_v26 = vsub.f32 0.0, %v632_v12 }
 0x13e   : > { %v1479_v27 = vpop.eup %1478  ;;  %v846_v60 = vadd.f32 1.0, %v1477_v44  ;;  %v686_v41 = vmul.f32 0.2, %v536_v8  ;;  %v754_v11 = vsub.f32 0.0, %v558_v24  ;;  %v687_v40 = vmul.f32 0.2, %v540_v57 }
 0x13f   : > { %972 = vst [vmem:[%s1879_s6 + $0x40] sm:$0xff] %v940_v46  ;;  %v1003_v4 = vadd.f32 %v1002_v42, %v940_v46  ;;  %v1041_v17 = vmul.f32 %v940_v46, %v940_v46  ;;  %v941_v61 = vmul.f32 %v1479_v27, %v717_v54  ;;  %v1481_v62 = vpop.eup %1480  ;;  %v702_v43 = vmul.f32 0.2, %v616_v15 }
 0x140   : > { %1492 = vrcp.f32 %v846_v60  ;;  %v847_v19 = vadd.f32 1.0, %v1481_v62  ;;  %vm670_vm8 = vcmp.ge.f32.partialorder %v616_v15, 0.0  ;;  %v800_v46 = vmul.f32 1.442695, %v754_v11 }
 0x141   : > { %v1483_v20 = vpop.eup %1482  ;;  %v1072_v10 = vadd.f32 %v1071_v13, %v1041_v17  ;;  %973 = vst [vmem:[%s1879_s6 + $0x48] sm:$0xff] %v941_v61  ;;  %v1004_v16 = vadd.f32 %v1003_v4, %v941_v61  ;;  %v1042_v30 = vmul.f32 %v941_v61, %v941_v61  ;;  %1494 = vpow2.f32 %v798_v6 }
 0x142   : > { %v1485_v42 = vpop.eup %1484  ;;  %v2055_v32 = vmul.f32 %v1483_v20, %v732_v50  ;;  %1496 = vrcp.f32 %v847_v19  ;;  %v620_v13 = vadd.f32 %v1932_v21, %v1810_v51  ;;  %v830_v21 = vmul.f32 1.442695, %v769_v26 }
 0x143   : > { %v1073_v22 = vadd.f32 %v1072_v10, %v1042_v30  ;;  %v862_v25 = vadd.f32 1.0, %v1485_v42  ;;  %v1487_v31 = vpop.eup %1486  ;;  %1498 = vpow2.f32 %v828_v0  ;;  %v546_v47 = vadd.f32 %v1953_v52, %v1810_v51 }
 0x144   : > { %988 = vst [vmem:[%s1879_s6 + $0xc0] sm:$0xff] %v2055_v32  ;;  %v863_v28 = vadd.f32 1.0, %v1487_v31  ;;  %v703_v44 = vmul.f32 0.2, %v620_v13  ;;  %vm671_vm9 = vcmp.ge.f32.partialorder %v620_v13, 0.0  ;;  %v562_v37 = vadd.f32 %v2008_v3, %v1800_v29 }
 0x145   : > { %1500 = vrcp.f32 %v862_v25  ;;  %v718_v54 = vsel %vm654_vm6, %v536_v8, %v686_v41  ;;  %v638_v50 = vadd.f32 %v2000_v35, %v1800_v29  ;;  %v719_v60 = vsel %vm655_vm7, %v540_v57, %v687_v40 }
 0x146   : > { %v1489_v7 = vpop.eup %1488  ;;  %1502 = vrcp.f32 %v863_v28  ;;  %v642_v4 = vadd.f32 %v2010_v49, %v1800_v29  ;;  %v734_v17 = vsel %vm670_vm8, %v616_v15, %v702_v43  ;;  %v735_v61 = vsel %vm671_vm9, %v620_v13, %v703_v44 }
 0x147   : > { %v2067_v33 = vmul.f32 %v1489_v7, %v733_v34  ;;  %v1491_v39 = vpop.eup %1490  ;;  %1504 = vpow2.f32 %v830_v21  ;;  %v755_v6 = vsub.f32 0.0, %v562_v37  ;;  %v770_v3 = vsub.f32 0.0, %v638_v50 }
 0x148   : > { %v848_v59 = vadd.f32 1.0, %v1491_v39  ;;  %vm656_vm10 = vcmp.ge.f32.partialorder %v546_v47, 0.0  ;;  %v688_v57 = vmul.f32 0.2, %v546_v47  ;;  %v771_v15 = vsub.f32 0.0, %v642_v4 }
 0x149   : > { %989 = vst [vmem:[%s1879_s6 + $0xc8] sm:$0xff] %v2067_v33  ;;  %v802_v30 = vmul.f32 1.442695, %v755_v6  ;;  %v832_v19 = vmul.f32 1.442695, %v770_v3  ;;  %v550_v31 = vadd.f32 %v1966_v36, %v1810_v51  ;;  %v626_v13 = vadd.f32 %v1955_v53, %v1810_v51 }
 0x14a   : > { %v1493_v27 = vpop.eup %1492  ;;  %1506 = vrcp.f32 %v848_v59  ;;  %v834_v24 = vmul.f32 1.442695, %v771_v15  ;;  %v720_v41 = vsel %vm656_vm10, %v546_v47, %v688_v57  ;;  %v630_v43 = vadd.f32 %v1973_v5, %v1810_v51 }
 0x14b   : > { %v942_v34 = vmul.f32 %v1493_v27, %v718_v54  ;;  %1508 = vpow2.f32 %v800_v46  ;;  %v1495_v52 = vpop.eup %1494  ;;  %vm657_vm11 = vcmp.ge.f32.partialorder %v550_v31, 0.0  ;;  %v689_v53 = vmul.f32 0.2, %v550_v31 }
 0x14c   : > { %v1497_v62 = vpop.eup %1496  ;;  %v849_v35 = vadd.f32 1.0, %v1495_v52  ;;  %v704_v40 = vmul.f32 0.2, %v626_v13  ;;  %vm672_vm12 = vcmp.ge.f32.partialorder %v626_v13, 0.0  ;;  %vm673_vm13 = vcmp.ge.f32.partialorder %v630_v43, 0.0 }
 0x14d   : > { %974 = vst [vmem:[%s1879_s6 + $0x50] sm:$0xff] %v942_v34  ;;  %v1005_v8 = vadd.f32 %v1004_v16, %v942_v34  ;;  %v1043_v55 = vmul.f32 %v942_v34, %v942_v34  ;;  %v1499_v20 = vpop.eup %1498  ;;  %v943_v10 = vmul.f32 %v1497_v62, %v719_v60  ;;  %v721_v47 = vsel %vm657_vm11, %v550_v31, %v689_v53 }
 0x14e   : > { %1510 = vrcp.f32 %v849_v35  ;;  %v864_v49 = vadd.f32 1.0, %v1499_v20  ;;  %v736_v27 = vsel %vm672_vm12, %v626_v13, %v704_v40  ;;  %v705_v34 = vmul.f32 0.2, %v630_v43 }
 0x14f   : > { %v1501_v42 = vpop.eup %1500  ;;  %v1074_v29 = vadd.f32 %v1073_v22, %v1043_v55  ;;  %975 = vst [vmem:[%s1879_s6 + $0x58] sm:$0xff] %v943_v10  ;;  %v1006_v0 = vadd.f32 %v1005_v8, %v943_v10  ;;  %v1044_v25 = vmul.f32 %v943_v10, %v943_v10  ;;  %1512 = vpow2.f32 %v802_v30 }
 0x150   : > { %v2084_v12 = vmul.f32 %v1501_v42, %v734_v17  ;;  %v1503_v16 = vpop.eup %1502  ;;  %1514 = vrcp.f32 %v864_v49  ;;  %v556_v60 = vadd.f32 %v1989_v38, %v1810_v51  ;;  %v737_v55 = vsel %vm673_vm13, %v630_v43, %v705_v34 }
 0x151   : > { %v1075_v22 = vadd.f32 %v1074_v29, %v1044_v25  ;;  %v2092_v7 = vmul.f32 %v1503_v16, %v735_v61  ;;  %1516 = vpow2.f32 %v832_v19  ;;  %v1505_v28 = vpop.eup %1504  ;;  %v560_v38 = vadd.f32 %v2002_v63, %v1810_v51 }
 0x152   : > { %990 = vst [vmem:[%s1879_s6 + $0xd0] sm:$0xff] %v2084_v12  ;;  %1518 = vpow2.f32 %v834_v24  ;;  %v865_v36 = vadd.f32 1.0, %v1505_v28  ;;  %v690_v35 = vmul.f32 0.2, %v556_v60  ;;  %vm658_vm14 = vcmp.ge.f32.partialorder %v556_v60, 0.0 }
 0x153   : > { %991 = vst [vmem:[%s1879_s6 + $0xd8] sm:$0xff] %v2092_v7  ;;  %v636_v10 = vadd.f32 %v1991_v48, %v1810_v51  ;;  %v640_v30 = vadd.f32 %v2004_v2, %v1810_v51  ;;  %v691_v63 = vmul.f32 0.2, %v560_v38  ;;  %vm659_vm15 = vcmp.ge.f32.partialorder %v560_v38, 0.0 }
 0x154   : > { %v1507_v26 = vpop.eup %1506  ;;  %1520 = vrcp.f32 %v865_v36  ;;  %v722_v29 = vsel %vm658_vm14, %v556_v60, %v690_v35  ;;  %v1050_v43 = vmul.f32 %v1900_v45, %v1900_v45 }
 0x155   : > { %v1509_v11 = vpop.eup %1508  ;;  %v944_v39 = vmul.f32 %v1507_v26, %v720_v41  ;;  %v706_v15 = vmul.f32 0.2, %v636_v10  ;;  %vm674_vm0 = vcmp.ge.f32.partialorder %v636_v10, 0.0  ;;  %v707_v48 = vmul.f32 0.2, %v640_v30 }
 0x156   : > { %v850_v21 = vadd.f32 1.0, %v1509_v11  ;;  %vm675_vm1 = vcmp.ge.f32.partialorder %v640_v30, 0.0  ;;  %v723_v16 = vsel %vm659_vm15, %v560_v38, %v691_v63 }
 0x157   : > { %976 = vst [vmem:[%s1879_s6 + $0x60] sm:$0xff] %v944_v39  ;;  %v1007_v44 = vadd.f32 %v1006_v0, %v944_v39  ;;  %v1045_v59 = vmul.f32 %v944_v39, %v944_v39  ;;  %v738_v31 = vsel %vm674_vm0, %v636_v10, %v706_v15  ;;  %v739_v24 = vsel %vm675_vm1, %v640_v30, %v707_v48 }
 0x158   : > { %1522 = vrcp.f32 %v850_v21  ;;  %v1511_v46 = vpop.eup %1510  ;;  %v1049_v39 = vmul.f32 %v1870_v58, %v1870_v58 }
 0x159   : > { %v1076_v37 = vadd.f32 %v1075_v22, %v1045_v59  ;;  %v1513_v54 = vpop.eup %1512  ;;  %v945_v50 = vmul.f32 %v1511_v46, %v721_v47 }
 0x15a   : > { %v1515_v4 = vpop.eup %1514  ;;  %v851_v5 = vadd.f32 1.0, %v1513_v54 }
 0x15b   : > { %v1517_v52 = vpop.eup %1516  ;;  %977 = vst [vmem:[%s1879_s6 + $0x68] sm:$0xff] %v945_v50  ;;  %v1008_v17 = vadd.f32 %v1007_v44, %v945_v50  ;;  %v1046_v61 = vmul.f32 %v945_v50, %v945_v50  ;;  %v2103_v6 = vmul.f32 %v1515_v4, %v736_v27 }
 0x15c   : > { %v1519_v3 = vpop.eup %1518  ;;  %1524 = vrcp.f32 %v851_v5  ;;  %v866_v62 = vadd.f32 1.0, %v1517_v52 }
 0x15d   : > { %v1077_v8 = vadd.f32 %v1076_v37, %v1046_v61  ;;  %992 = vst [vmem:[%s1879_s6 + $0xe0] sm:$0xff] %v2103_v6  ;;  %v867_v20 = vadd.f32 1.0, %v1519_v3 }
 0x15e   : > { %1526 = vrcp.f32 %v866_v62  ;;  %v1521_v57 = vpop.eup %1520 }
 0x15f   : > { %1528 = vrcp.f32 %v867_v20  ;;  %v2113_v19 = vmul.f32 %v1521_v57, %v737_v55 }
 0x161   : > { %993 = vst [vmem:[%s1879_s6 + $0xe8] sm:$0xff] %v2113_v19 }
 0x162   : > { %v1523_v42 = vpop.eup %1522 }
 0x163   : > { %v946_v49 = vmul.f32 %v1523_v42, %v722_v29 }
 0x165   : > { %978 = vst [vmem:[%s1879_s6 + $0x70] sm:$0xff] %v946_v49  ;;  %v1009_v0 = vadd.f32 %v1008_v17, %v946_v49  ;;  %v1047_v25 = vmul.f32 %v946_v49, %v946_v49 }
 0x166   : > { %v1525_v51 = vpop.eup %1524 }
 0x167   : > { %v1078_v2 = vadd.f32 %v1077_v8, %v1047_v25  ;;  %v947_v13 = vmul.f32 %v1525_v51, %v723_v16 }
 0x168   : > { %v1527_v22 = vpop.eup %1526 }
 0x169   : > { %v1529_v28 = vpop.eup %1528  ;;  %979 = vst [vmem:[%s1879_s6 + $0x78] sm:$0xff] %v947_v13  ;;  %v1010_v26 = vadd.f32 %v1009_v0, %v947_v13  ;;  %v1048_v41 = vmul.f32 %v947_v13, %v947_v13  ;;  %v2121_v36 = vmul.f32 %v1527_v22, %v738_v31 }
 0x16a   : > { %v2130_v11 = vmul.f32 %v1529_v28, %v739_v24 }
 0x16b   : > { %v1011_v53 = vadd.f32 %v1010_v26, %v1870_v58  ;;  %v1079_v40 = vadd.f32 %v1078_v2, %v1048_v41  ;;  %994 = vst [vmem:[%s1879_s6 + $0xf0] sm:$0xff] %v2121_v36 }
 0x16c   : > { %995 = vst [vmem:[%s1879_s6 + $0xf8] sm:$0xff] %v2130_v11 }
 0x16d   : > { %v1012_v21 = vadd.f32 %v1011_v53, %v1900_v45  ;;  %v1080_v44 = vadd.f32 %v1079_v40, %v1049_v39 }
 0x16e   : > { %1543 = shalt.err (!%p1540_p5)
}
 0x16f   : > { %s1544_s24 = scalar_lea.hbm %s2126_s11, 4096  ;;  %s1548_s5 = scalar_lea.hbm %s2264_s3, 8192 }
 0x170   : > { %p1545_p6 = scmp.ne.s32.totalorder %s2126_s11, %s1544_s24  ;;  %p1549_p10 = scmp.lt.u32.totalorder %s2126_s11, %s2264_s3 }
 0x171   : > { %p1550_p11 = scmp.lt.u32.totalorder %s1548_s5, %s1544_s24  ;;  %p1552_p13 = scmp.lt.u32.totalorder %s1544_s24, %s2126_s11 }
 0x172   : > { %p1546_p7 = pnand %p1545_p6, %p1712_p4 }
 0x173   : > { %p1551_p12 = por %p1550_p11, %p1549_p10 }
 0x174   : > { %p1547_p9 = pneg %p1546_p7 }
 0x175   : > { %p1553_p0 = por %p1552_p13, %p1551_p12 }
 0x177   : > { %p1554_p1 = pnand %p1553_p0, %p1547_p9 }
 0x179   : > { %1557 = shalt.err (!%p1554_p1)
}
 0x17a   : > { %s1644_s9 = smov 128   ;;  %s1645_s10 = smov 8   ;;  %v1051_v58 = vmul.f32 %v1927_v14, %v1927_v14  ;;  %v1013_v45 = vadd.f32 %v1012_v21, %v1927_v14  ;;  %v1081_v59 = vadd.f32 %v1080_v44, %v1050_v43  ;;  %v1052_v46 = vmul.f32 %v1949_v18, %v1949_v18 }
 0x17b   : > { %1315 = dma.vmem_to_hbm [thread:$0]  (%p1712_p4), %s2128_s8, 4096, %s2126_s11, %s1106_s12, %s1644_s9, %s1644_s9, %s1645_s10   ;;  %v1053_v27 = vmul.f32 %v1975_v9, %v1975_v9  ;;  %v1054_v34 = vmul.f32 %v1993_v23, %v1993_v23  ;;  %v1055_v14 = vmul.f32 %v2030_v1, %v2030_v1  ;;  %v1062_v30 = vmul.f32 %v2113_v19, %v2113_v19 }
 0x17c   : > { %v1014_v37 = vadd.f32 %v1013_v45, %v1949_v18  ;;  %v1082_v47 = vadd.f32 %v1081_v59, %v1051_v58  ;;  %v1056_v18 = vmul.f32 %v2038_v56, %v2038_v56  ;;  %v1063_v49 = vmul.f32 %v2121_v36, %v2121_v36  ;;  %s1258_s8 = sshll.u32 %s1843_s30, 1  ;;  %s1304_s11 = sshll.u32 %s1632_s18, 5 }
 0x17d   : > { %v1064_v15 = vmul.f32 %v2130_v11, %v2130_v11  ;;  %s228_s12 = scalar_lea.vmem [#allocation4], %s1258_s8  ;;  %vm1102_vm2 = vcmask 1040384   ;;  %s2213_s22 = scalar_lea.hbm %s2265_s4, %s1304_s11 }
 0x17e   : > { %v1015_v54 = vadd.f32 %v1014_v37, %v1975_v9  ;;  %v1083_v50 = vadd.f32 %v1082_v47, %v1052_v46  ;;  %v1057_v9 = vmul.f32 %v2055_v32, %v2055_v32  ;;  %s1143_s13 = sshll.u32 %s228_s12, 4  ;;  %s1111_s24 = scalar_lea.sflag [#allocation5], %s1843_s30  ;;  %s2215_s13 = int_to_ptr.vmem [resolvable:$true] %s1143_s13 }
 0x17f   : > { %s1558_s26 = scalar_lea.vmem %s2215_s13, 32  ;;  %s1646_s18 = smov [#allocation4]  }
 0x180   : > { %v1016_v60 = vadd.f32 %v1015_v54, %v1993_v23  ;;  %v1084_v4 = vadd.f32 %v1083_v50, %v1053_v27  ;;  %v1058_v23 = vmul.f32 %v2067_v33, %v2067_v33  ;;  %p1559_p2 = scmp.ne.s32.totalorder %s2215_s13, %s1558_s26  ;;  %s1562_s29 = sshll.u32 %s1646_s18, 4  ;;  %s1563_s29 = int_to_ptr.vmem [resolvable:$false] %s1562_s29 }
 0x181   : > { %s1564_s5 = scalar_lea.vmem %s1563_s29, 64  ;;  %p1565_p6 = scmp.lt.s32.totalorder %s2215_s13, %s1563_s29 }
 0x182   : > { %v1085_v5 = vadd.f32 %v1084_v4, %v1054_v34  ;;  %v1017_v52 = vadd.f32 %v1016_v60, %v2030_v1  ;;  %v1059_v1 = vmul.f32 %v2084_v12, %v2084_v12  ;;  %p1560_p3 = pnand %p1559_p2, %p1712_p4  ;;  %p1566_p7 = scmp.lt.s32.totalorder %s1564_s5, %s1558_s26 }
 0x184   : > { %v1018_v17 = vadd.f32 %v1017_v52, %v2038_v56  ;;  %v1086_v61 = vadd.f32 %v1085_v5, %v1055_v14  ;;  %v1060_v56 = vmul.f32 %v2092_v7, %v2092_v7  ;;  %p1561_p5 = pneg %p1560_p3  ;;  %p1567_p9 = por %p1566_p7, %p1565_p6 }
 0x186   : > { %v1019_v3 = vadd.f32 %v1018_v17, %v2055_v32  ;;  %v1087_v62 = vadd.f32 %v1086_v61, %v1056_v18  ;;  %v1061_v32 = vmul.f32 %v2103_v6, %v2103_v6  ;;  %p1568_p10 = pnand %p1567_p9, %p1561_p5 }
 0x188   : > { %v1020_v8 = vadd.f32 %v1019_v3, %v2067_v33  ;;  %v1088_v55 = vadd.f32 %v1087_v62, %v1057_v9 }
 0x18a   : > { %v1021_v35 = vadd.f32 %v1020_v8, %v2084_v12  ;;  %v1089_v20 = vadd.f32 %v1088_v55, %v1058_v23 }
 0x18c   : > { %v1022_v38 = vadd.f32 %v1021_v35, %v2092_v7  ;;  %v1090_v10 = vadd.f32 %v1089_v20, %v1059_v1 }
 0x18e   : > { %v1023_v57 = vadd.f32 %v1022_v38, %v2103_v6  ;;  %v1091_v33 = vadd.f32 %v1090_v10, %v1060_v56 }
 0x190   : > { %v1024_v42 = vadd.f32 %v1023_v57, %v2113_v19  ;;  %v1092_v12 = vadd.f32 %v1091_v33, %v1061_v32 }
 0x192   : > { %v1025_v29 = vadd.f32 %v1024_v42, %v2121_v36  ;;  %v1093_v7 = vadd.f32 %v1092_v12, %v1062_v30 }
 0x194   : > { %v1026_v63 = vadd.f32 %v1025_v29, %v2130_v11  ;;  %v1094_v6 = vadd.f32 %v1093_v7, %v1063_v49 }
 0x196   : > { %v1027_v48 = vrot.slane %v1026_v63, 4  ;;  %v1095_v0 = vadd.f32 %v1094_v6, %v1064_v15 }
 0x198   : > { %v1028_v25 = vadd.f32 %v1027_v48, %v1026_v63  ;;  %v1096_v51 = vrot.slane %v1095_v0, 4 }
 0x19a   : > { %v1029_v19 = vrot.slane %v1028_v25, 2  ;;  %v1097_v2 = vadd.f32 %v1096_v51, %v1095_v0 }
 0x19c   : > { %v1030_v16 = vadd.f32 %v1029_v19, %v1028_v25  ;;  %v1098_v31 = vrot.slane %v1097_v2, 2 }
 0x19e   : > { %v1031_v13 = vrot.slane %v1030_v16, 1  ;;  %v1099_v24 = vadd.f32 %v1098_v31, %v1097_v2 }
 0x1a0   : > { %v1100_v22 = vrot.slane %v1099_v24, 1  ;;  %v1032_v28 = vadd.f32 %v1031_v13, %v1030_v16 }
 0x1a2   : > { %v1101_v26 = vadd.f32 %v1100_v22, %v1099_v24 }
 0x1a4   : > { %v1103_v41 = vsel %vm1102_vm2, %v1032_v28, %v1101_v26 }
 0x1a5   : > { %1104 = vst [vmem:[%s228_s12] sm:$0x3] %v1103_v41 }
 0x1a6   : > { %1571 = shalt.err (!%p1568_p10)
}
 0x1a7   : > { %s1572_s30 = scalar_lea.hbm %s2213_s22, 32  ;;  %s1576_s9 = scalar_lea.hbm %s2265_s4, 64 }
 0x1a8   : > { %p1573_p11 = scmp.ne.s32.totalorder %s2213_s22, %s1572_s30  ;;  %p1577_p0 = scmp.lt.u32.totalorder %s2213_s22, %s2265_s4 }
 0x1a9   : > { %p1578_p1 = scmp.lt.u32.totalorder %s1576_s9, %s1572_s30  ;;  %p1580_p3 = scmp.lt.u32.totalorder %s1572_s30, %s2213_s22 }
 0x1aa   : > { %p1574_p12 = pnand %p1573_p11, %p1712_p4 }
 0x1ab   : > { %p1579_p2 = por %p1578_p1, %p1577_p0 }
 0x1ac   : > { %p1575_p13 = pneg %p1574_p12 }
 0x1ad   : > { %p1581_p5 = por %p1580_p3, %p1579_p2 }
 0x1af   : > { %p1582_p6 = pnand %p1581_p5, %p1575_p13 }
 0x1b1   : > { %1585 = shalt.err (!%p1582_p6)
}
 0x1b2   : > { %1316 = dma.vmem_to_hbm [thread:$0]  (%p1712_p4), %s2215_s13, 32, %s2213_s22, %s1111_s24  }
 0x1b3 PF: > { %p1326_p7 = scmp.ge.s32.totalorder %s1640_s20, 2  ;;  %s1155_s11 = sand.u32 1, %s1620_s15  }
 0x1b4   : > { %s1156_s12 = scalar_lea.sflag [#allocation3], %s1155_s11 }
 0x1b5   : > { %p1320_p9 = pnand %p1326_p7, %p1719_p8 }
 0x1b7   : > { %1611 = dma.done.wait (!%p1320_p9), %s1156_s12, 4096  }
 0x1b8   : > { %1613 = vsyncadd (!%p1320_p9), %s1156_s12, 4294963200  ;;  %s1165_s14 = scalar_lea.sflag [#allocation5], %s1155_s11 }
 0x1b9   : > { %1615 = dma.done.wait (!%p1320_p9), %s1165_s14, 32  }
 0x1ba   : > { %1617 = vsyncadd (!%p1320_p9), %s1165_s14, 4294967264  ;;  %s21_s20 = sadd.s32 1, %s1640_s20   ;;  %s2268_s15 = smov %s1624_s16 }
 0x1bb   : > { %p18_p10 = scmp.ge.s32.totalorder %s21_s20, 4   ;;  %s2269_s16 = smov %s1628_s17 }
 0x1bc   : > { %s2270_s17 = smov %s1725_s28  ;;  %s2271_s18 = smov %s1636_s19 }
 0x1bd   : > { %s2272_s19 = smov %s2274_s23  ;;  %20 = sbr.rel (!%p18_p10) target bundleno = 6 (0x6), region = 84 }
 0x1c4   :  { %1170 = vsyncpa [#allocation3], 1 }
 0x1c5   :  { %1172 = vsyncpa [#allocation3 + $0x1], 1 }
 0x1c6   :  { %1173 = vsyncpa [#allocation5], 1 }
 0x1c7   :  { %1175 = vsyncpa [#allocation5 + $0x1], 1 }

</bundles_post_ra>
